<compile_context>
chip_gen: v5e
topology: v5e:2x2
jax: 0.10.0
libtpu: 0.0.40
codegen_flags: <defaults>
</compile_context>

<pallas_src>
import jax
import jax.numpy as jnp
from jax.experimental import pallas as pl
from jax.experimental.pallas import tpu as pltpu


def _round_up(x, m):
    return ((x + m - 1) // m) * m


def _cdiv(a, b):
    return (a + b - 1) // b


def _mlp_kernel(x_ref,
                w1_ref, b1_ref,
                w2_ref, b2_ref,
                w3_ref, b3_ref,
                w4_ref, b4_ref,
                o_ref):
    # x tile: (TILE_B, in3) f32 straight from HBM; cast to bf16 in VMEM for MXU.
    x = x_ref[...].astype(jnp.bfloat16)

    # Linear(3F -> F) + Tanh   (bf16 operands, f32 accumulate + activation)
    h1 = jnp.dot(x, w1_ref[...], preferred_element_type=jnp.float32) + b1_ref[...]
    h1 = jnp.tanh(h1)

    # Linear(F -> F//5) + Sigmoid
    h2 = jnp.dot(h1.astype(jnp.bfloat16), w2_ref[...],
                 preferred_element_type=jnp.float32) + b2_ref[...]
    h2 = jax.nn.sigmoid(h2)

    # Linear(F//5 -> F//10) + Tanh
    h3 = jnp.dot(h2.astype(jnp.bfloat16), w3_ref[...],
                 preferred_element_type=jnp.float32) + b3_ref[...]
    h3 = jnp.tanh(h3)

    # Linear(F//10 -> C_pad) + Softmax (padded logit columns carry -1e30 bias).
    logits = jnp.dot(h3.astype(jnp.bfloat16), w4_ref[...],
                     preferred_element_type=jnp.float32) + b4_ref[...]
    m = jnp.max(logits, axis=-1, keepdims=True)
    e = jnp.exp(logits - m)
    denom = jnp.sum(e, axis=-1, keepdims=True)
    o_ref[...] = (e / denom).astype(o_ref.dtype)       # exact normalization


def prepare_params(params):
    """Pad + cast weights once (call at init, reuse across forward calls).

    Weights become bf16 with output dims zero-padded to multiples of 128; w1
    keeps its true input width (no K padding needed since x is passed
    unpadded).  Biases stay f32; the final bias pads with -1e30 so padded
    logit columns do not pollute the softmax denominator.  Zero padding is
    exact through the net: tanh(0)=0 and sigmoid(0)=0.5 only ever multiply
    zero-padded rows of the next weight matrix.
    """
    (w1, b1), (w2, b2), (w3, b3), (w4, b4) = params
    in3 = w1.shape[0]
    f, f5, f10, c = w1.shape[1], w2.shape[1], w3.shape[1], w4.shape[1]
    D1, D2, D3, D4 = (_round_up(d, 128) for d in (f, f5, f10, c))

    def padw(w, rows, cols):
        w = w.astype(jnp.float32)
        w = jnp.pad(w, ((0, rows - w.shape[0]), (0, cols - w.shape[1])))
        return w.astype(jnp.bfloat16)

    def padb(b, cols, fill=0.0):
        b = b.astype(jnp.float32).reshape(1, -1)
        return jnp.pad(b, ((0, 0), (0, cols - b.shape[1])), constant_values=fill)

    w1p = padw(w1, in3, D1)
    w2p = padw(w2, D1, D2)
    w3p = padw(w3, D2, D3)
    w4p = padw(w4, D3, D4)
    b1p = padb(b1, D1)
    b2p = padb(b2, D2)
    b3p = padb(b3, D3)
    b4p = padb(b4, D4, fill=-1e30)
    return (w1p, b1p, w2p, b2p, w3p, b3p, w4p, b4p, c)


def cnn_forward(x, prepped, *, tile_b_max=1024):
    """x: any shape (B, ...) flattening to (B, 3*input_size). Returns (B, C)."""
    w1p, b1p, w2p, b2p, w3p, b3p, w4p, b4p, c = prepped
    B = x.shape[0]
    x2d = x.reshape(B, -1).astype(jnp.float32)          # nn.Flatten()
    in3 = x2d.shape[1]
    assert in3 == w1p.shape[0]
    D1, D2, D3, D4 = w1p.shape[1], w2p.shape[1], w3p.shape[1], w4p.shape[1]

    # Batch tiling: 16-aligned tiles (bf16 sublane packing), sized from the
    # tile count so padding waste is < one tile; >= 2 tiles for moderate B so
    # the "parallel" batch axis can be split across v7x's two TensorCores.
    n_tiles = max(1, _cdiv(B, tile_b_max))
    if n_tiles == 1 and B >= 32:
        n_tiles = 2
    tile_b = _round_up(_cdiv(B, n_tiles), 16)
    b_pad = n_tiles * tile_b

    xp = x2d
    if b_pad != B:
        xp = jnp.pad(xp, ((0, b_pad - B), (0, 0)))       # batch-dim pad only

    resident = lambda i: (0, 0)   # weights/biases stay put across batch tiles

    out = pl.pallas_call(
        _mlp_kernel,
        out_shape=jax.ShapeDtypeStruct((b_pad, D4), jnp.float32),
        grid=(n_tiles,),
        in_specs=[
            pl.BlockSpec((tile_b, in3), lambda i: (i, 0)),   # x: batch-tiled, unpadded features
            pl.BlockSpec((in3, D1), resident),
            pl.BlockSpec((1, D1), resident),
            pl.BlockSpec((D1, D2), resident),
            pl.BlockSpec((1, D2), resident),
            pl.BlockSpec((D2, D3), resident),
            pl.BlockSpec((1, D3), resident),
            pl.BlockSpec((D3, D4), resident),
            pl.BlockSpec((1, D4), resident),
        ],
        out_specs=pl.BlockSpec((tile_b, D4), lambda i: (i, 0)),
        compiler_params=pltpu.CompilerParams(
            dimension_semantics=("parallel",),
            # Safe on every chip: < v7x's 64 MiB physical, well under v5e/v6e 128 MiB.
            vmem_limit_bytes=48 * 1024 * 1024,
        ),
    )(xp, w1p, b1p, w2p, b2p, w3p, b3p, w4p, b4p)

    # Drop batch padding and padded class columns.
    return out[:B, :c]


def init_params(key, input_size, num_classes):
    """Mirror nn.Linear's U(-1/sqrt(fan_in), 1/sqrt(fan_in)); weights as (in, out)."""
    dims = [(input_size * 3, input_size),
            (input_size, input_size // 5),
            (input_size // 5, input_size // 10),
            (input_size // 10, num_classes)]
    params = []
    for fan_in, fan_out in dims:
        key, kw, kb = jax.random.split(key, 3)
        bound = 1.0 / (fan_in ** 0.5)
        w = jax.random.uniform(kw, (fan_in, fan_out), jnp.float32, -bound, bound)
        b = jax.random.uniform(kb, (1, fan_out), jnp.float32, -bound, bound)
        params.append((w, b))
    return params


def reference_forward(x, params):
    """Pure-JAX f32 reference matching the PyTorch module."""
    x = x.reshape(x.shape[0], -1).astype(jnp.float32)
    (w1, b1), (w2, b2), (w3, b3), (w4, b4) = params
    h = jnp.tanh(x @ w1 + b1)
    h = jax.nn.sigmoid(h @ w2 + b2)
    h = jnp.tanh(h @ w3 + b3)
    return jax.nn.softmax(h @ w4 + b4, axis=-1)


if __name__ == "__main__":
    key = jax.random.PRNGKey(0)
    input_size = 50          # -> hidden sizes 50, 10, 5
    num_classes = 4
    batch = 2

    k_x, k_p = jax.random.split(key)
    # "image"-like input (B, 3, input_size); Flatten gives (B, 3*input_size).
    x = jax.random.normal(k_x, (batch, 3, input_size), jnp.float32)
    params = init_params(k_p, input_size, num_classes)
    prepped = prepare_params(params)          # pad/cast weights ONCE

    forward = jax.jit(lambda a: cnn_forward(a, prepped))
    out = jax.block_until_ready(forward(x))

    assert out.shape == (batch, num_classes)
    # Exact softmax divide -> rows sum to 1 to f32 precision.
    assert bool(jnp.all(jnp.abs(jnp.sum(out, axis=-1) - 1.0) < 1e-5))
    # Matches the f32 reference within bf16-matmul tolerance.
    ref = reference_forward(x, params)
    assert bool(jnp.max(jnp.abs(out - ref)) < 5e-2)
    print("KERNEL_OK")
</pallas_src>

<mosaic_0001>
module attributes {stable_mosaic.version = 11 : i64} {
  func.func @_mlp_kernel(%arg0: i32, %arg1: memref<16x150xf32, #tpu.memory_space<vmem>>, %arg2: memref<150x128xbf16, #tpu.memory_space<vmem>>, %arg3: memref<1x128xf32, #tpu.memory_space<vmem>>, %arg4: memref<128x128xbf16, #tpu.memory_space<vmem>>, %arg5: memref<1x128xf32, #tpu.memory_space<vmem>>, %arg6: memref<128x128xbf16, #tpu.memory_space<vmem>>, %arg7: memref<1x128xf32, #tpu.memory_space<vmem>>, %arg8: memref<128x128xbf16, #tpu.memory_space<vmem>>, %arg9: memref<1x128xf32, #tpu.memory_space<vmem>>, %arg10: memref<16x128xf32, #tpu.memory_space<vmem>>) attributes {dimension_semantics = [#tpu.dimension_semantics<parallel>], iteration_bounds = array<i64: 1>, scalar_prefetch = 0 : i64, scratch_operands = 0 : i64, tpu.core_type = #tpu.core_type<tc>, window_params = [{transform_indices = @transform_0, window_bounds = array<i64: 16, 150>}, {pipeline_mode = #tpu.pipeline_mode<synchronous>, transform_indices = @transform_1, window_bounds = array<i64: 150, 128>}, {pipeline_mode = #tpu.pipeline_mode<synchronous>, transform_indices = @transform_2, window_bounds = array<i64: 1, 128>}, {pipeline_mode = #tpu.pipeline_mode<synchronous>, transform_indices = @transform_3, window_bounds = array<i64: 128, 128>}, {pipeline_mode = #tpu.pipeline_mode<synchronous>, transform_indices = @transform_4, window_bounds = array<i64: 1, 128>}, {pipeline_mode = #tpu.pipeline_mode<synchronous>, transform_indices = @transform_5, window_bounds = array<i64: 128, 128>}, {pipeline_mode = #tpu.pipeline_mode<synchronous>, transform_indices = @transform_6, window_bounds = array<i64: 1, 128>}, {pipeline_mode = #tpu.pipeline_mode<synchronous>, transform_indices = @transform_7, window_bounds = array<i64: 128, 128>}, {pipeline_mode = #tpu.pipeline_mode<synchronous>, transform_indices = @transform_8, window_bounds = array<i64: 1, 128>}, {transform_indices = @transform_9, window_bounds = array<i64: 16, 128>}]} {
    %c0 = arith.constant 0 : index
    %c0_0 = arith.constant 0 : index
    %0 = vector.load %arg1[%c0, %c0_0] : memref<16x150xf32, #tpu.memory_space<vmem>>, vector<16x150xf32>
    %1 = arith.truncf %0 : vector<16x150xf32> to vector<16x150xbf16>
    %c0_1 = arith.constant 0 : index
    %c0_2 = arith.constant 0 : index
    %2 = vector.load %arg2[%c0_1, %c0_2] : memref<150x128xbf16, #tpu.memory_space<vmem>>, vector<150x128xbf16>
    %cst = arith.constant dense<0.000000e+00> : vector<16x128xf32>
    %3 = tpu.matmul %1, %2, %cst {dimension_numbers = #tpu.dot_dimension_numbers<[1], [0], [0], [1], [0, 0, 1, 1], [], []>} : vector<16x150xbf16>, vector<150x128xbf16>, vector<16x128xf32> -> vector<16x128xf32>
    %c0_3 = arith.constant 0 : index
    %c0_4 = arith.constant 0 : index
    %4 = vector.load %arg3[%c0_3, %c0_4] : memref<1x128xf32, #tpu.memory_space<vmem>>, vector<1x128xf32>
    %5 = vector.broadcast %4 : vector<1x128xf32> to vector<16x128xf32>
    %6 = arith.addf %3, %5 : vector<16x128xf32>
    %7 = math.tanh %6 : vector<16x128xf32>
    %8 = arith.truncf %7 : vector<16x128xf32> to vector<16x128xbf16>
    %c0_5 = arith.constant 0 : index
    %c0_6 = arith.constant 0 : index
    %9 = vector.load %arg4[%c0_5, %c0_6] : memref<128x128xbf16, #tpu.memory_space<vmem>>, vector<128x128xbf16>
    %cst_7 = arith.constant dense<0.000000e+00> : vector<16x128xf32>
    %10 = tpu.matmul %8, %9, %cst_7 {dimension_numbers = #tpu.dot_dimension_numbers<[1], [0], [0], [1], [0, 0, 1, 1], [], []>} : vector<16x128xbf16>, vector<128x128xbf16>, vector<16x128xf32> -> vector<16x128xf32>
    %c0_8 = arith.constant 0 : index
    %c0_9 = arith.constant 0 : index
    %11 = vector.load %arg5[%c0_8, %c0_9] : memref<1x128xf32, #tpu.memory_space<vmem>>, vector<1x128xf32>
    %12 = vector.broadcast %11 : vector<1x128xf32> to vector<16x128xf32>
    %13 = arith.addf %10, %12 : vector<16x128xf32>
    %14 = arith.negf %13 : vector<16x128xf32>
    %15 = math.exp %14 : vector<16x128xf32>
    %cst_10 = arith.constant 1.000000e+00 : f32
    %16 = vector.broadcast %cst_10 : f32 to vector<16x128xf32>
    %17 = arith.addf %16, %15 : vector<16x128xf32>
    %18 = arith.divf %16, %17 : vector<16x128xf32>
    %19 = arith.truncf %18 : vector<16x128xf32> to vector<16x128xbf16>
    %c0_11 = arith.constant 0 : index
    %c0_12 = arith.constant 0 : index
    %20 = vector.load %arg6[%c0_11, %c0_12] : memref<128x128xbf16, #tpu.memory_space<vmem>>, vector<128x128xbf16>
    %cst_13 = arith.constant dense<0.000000e+00> : vector<16x128xf32>
    %21 = tpu.matmul %19, %20, %cst_13 {dimension_numbers = #tpu.dot_dimension_numbers<[1], [0], [0], [1], [0, 0, 1, 1], [], []>} : vector<16x128xbf16>, vector<128x128xbf16>, vector<16x128xf32> -> vector<16x128xf32>
    %c0_14 = arith.constant 0 : index
    %c0_15 = arith.constant 0 : index
    %22 = vector.load %arg7[%c0_14, %c0_15] : memref<1x128xf32, #tpu.memory_space<vmem>>, vector<1x128xf32>
    %23 = vector.broadcast %22 : vector<1x128xf32> to vector<16x128xf32>
    %24 = arith.addf %21, %23 : vector<16x128xf32>
    %25 = math.tanh %24 : vector<16x128xf32>
    %26 = arith.truncf %25 : vector<16x128xf32> to vector<16x128xbf16>
    %c0_16 = arith.constant 0 : index
    %c0_17 = arith.constant 0 : index
    %27 = vector.load %arg8[%c0_16, %c0_17] : memref<128x128xbf16, #tpu.memory_space<vmem>>, vector<128x128xbf16>
    %cst_18 = arith.constant dense<0.000000e+00> : vector<16x128xf32>
    %28 = tpu.matmul %26, %27, %cst_18 {dimension_numbers = #tpu.dot_dimension_numbers<[1], [0], [0], [1], [0, 0, 1, 1], [], []>} : vector<16x128xbf16>, vector<128x128xbf16>, vector<16x128xf32> -> vector<16x128xf32>
    %c0_19 = arith.constant 0 : index
    %c0_20 = arith.constant 0 : index
    %29 = vector.load %arg9[%c0_19, %c0_20] : memref<1x128xf32, #tpu.memory_space<vmem>>, vector<1x128xf32>
    %30 = vector.broadcast %29 : vector<1x128xf32> to vector<16x128xf32>
    %31 = arith.addf %28, %30 : vector<16x128xf32>
    %cst_21 = arith.constant dense<0xFF800000> : vector<16xf32>
    %32 = vector.multi_reduction <maximumf>, %31, %cst_21 [1] : vector<16x128xf32> to vector<16xf32>
    %33 = vector.shape_cast %32 : vector<16xf32> to vector<16x1xf32>
    %34 = vector.broadcast %33 : vector<16x1xf32> to vector<16x128xf32>
    %35 = arith.subf %31, %34 : vector<16x128xf32>
    %36 = math.exp %35 : vector<16x128xf32>
    %cst_22 = arith.constant dense<0.000000e+00> : vector<16xf32>
    %37 = vector.multi_reduction <add>, %36, %cst_22 [1] : vector<16x128xf32> to vector<16xf32>
    %38 = vector.shape_cast %37 : vector<16xf32> to vector<16x1xf32>
    %39 = vector.broadcast %38 : vector<16x1xf32> to vector<16x128xf32>
    %40 = arith.divf %36, %39 : vector<16x128xf32>
    %c0_23 = arith.constant 0 : index
    %c0_24 = arith.constant 0 : index
    %41 = vector.load %arg10[%c0_23, %c0_24] : memref<16x128xf32, #tpu.memory_space<vmem>>, vector<16x128xf32>
    tpu.vector_store %arg10[%c0_23, %c0_24], %40 {strides = array<i32>} : memref<16x128xf32, #tpu.memory_space<vmem>>, vector<16x128xf32>,
    return
  }
  func.func @transform_0(%arg0: i32) -> (i32, i32) {
    %c0_i32 = arith.constant 0 : i32
    %c0_i32_0 = arith.constant 0 : i32
    return %arg0, %c0_i32 : i32, i32
  }
  func.func @transform_1(%arg0: i32) -> (i32, i32) {
    %c0_i32 = arith.constant 0 : i32
    %c0_i32_0 = arith.constant 0 : i32
    %c0_i32_1 = arith.constant 0 : i32
    return %c0_i32, %c0_i32_0 : i32, i32
  }
  func.func @transform_2(%arg0: i32) -> (i32, i32) {
    %c0_i32 = arith.constant 0 : i32
    %c0_i32_0 = arith.constant 0 : i32
    %c0_i32_1 = arith.constant 0 : i32
    return %c0_i32, %c0_i32_0 : i32, i32
  }
  func.func @transform_3(%arg0: i32) -> (i32, i32) {
    %c0_i32 = arith.constant 0 : i32
    %c0_i32_0 = arith.constant 0 : i32
    %c0_i32_1 = arith.constant 0 : i32
    return %c0_i32, %c0_i32_0 : i32, i32
  }
  func.func @transform_4(%arg0: i32) -> (i32, i32) {
    %c0_i32 = arith.constant 0 : i32
    %c0_i32_0 = arith.constant 0 : i32
    %c0_i32_1 = arith.constant 0 : i32
    return %c0_i32, %c0_i32_0 : i32, i32
  }
  func.func @transform_5(%arg0: i32) -> (i32, i32) {
    %c0_i32 = arith.constant 0 : i32
    %c0_i32_0 = arith.constant 0 : i32
    %c0_i32_1 = arith.constant 0 : i32
    return %c0_i32, %c0_i32_0 : i32, i32
  }
  func.func @transform_6(%arg0: i32) -> (i32, i32) {
    %c0_i32 = arith.constant 0 : i32
    %c0_i32_0 = arith.constant 0 : i32
    %c0_i32_1 = arith.constant 0 : i32
    return %c0_i32, %c0_i32_0 : i32, i32
  }
  func.func @transform_7(%arg0: i32) -> (i32, i32) {
    %c0_i32 = arith.constant 0 : i32
    %c0_i32_0 = arith.constant 0 : i32
    %c0_i32_1 = arith.constant 0 : i32
    return %c0_i32, %c0_i32_0 : i32, i32
  }
  func.func @transform_8(%arg0: i32) -> (i32, i32) {
    %c0_i32 = arith.constant 0 : i32
    %c0_i32_0 = arith.constant 0 : i32
    %c0_i32_1 = arith.constant 0 : i32
    return %c0_i32, %c0_i32_0 : i32, i32
  }
  func.func @transform_9(%arg0: i32) -> (i32, i32) {
    %c0_i32 = arith.constant 0 : i32
    %c0_i32_0 = arith.constant 0 : i32
    return %arg0, %c0_i32 : i32, i32
  }
}

</mosaic_0001>

<bundles_post_ra>
// kernel: _lambda_.1
= control target key start
LH: loop header
LB: loop body
LE: loop exit
PB: predicated region body
PF: predicated region fallthrough
CT: control target
= control target key end

     0   :  { %14 = vsyncpa [#allocation3], 0  ;;  %s940_s0 = inlined_call_operand.vmem [shape: f32[16,150], index: 0, kind: input, shape index: {}]   ;;  %s941_s1 = inlined_call_operand.hbm [shape: bf16[150,128], index: 1, kind: input, shape index: {}]   ;;  %s942_s2 = inlined_call_operand.vmem [shape: f32[1,128], index: 2, kind: input, shape index: {}]   ;;  %s943_s3 = inlined_call_operand.hbm [shape: bf16[128,128], index: 3, kind: input, shape index: {}]   ;;  %s944_s4 = inlined_call_operand.vmem [shape: f32[1,128], index: 4, kind: input, shape index: {}]   ;;  %s945_s5 = inlined_call_operand.hbm [shape: bf16[128,128], index: 5, kind: input, shape index: {}]   ;;  %s946_s6 = inlined_call_operand.vmem [shape: f32[1,128], index: 6, kind: input, shape index: {}]   ;;  %s947_s7 = inlined_call_operand.vmem [shape: bf16[128,128], index: 7, kind: input, shape index: {}]   ;;  %s948_s8 = inlined_call_operand.vmem [shape: f32[1,128], index: 8, kind: input, shape index: {}]   ;;  %s949_s9 = inlined_call_operand.vmem [shape: f32[16,128], index: 9, kind: output, shape index: {}]  }
   0x1   :  { %15 = vsyncpa [#allocation5], 0  ;;  %s37_s11 = sshll.u32 %s943_s3, 4  ;;  %s822_s12 = smov [#allocation4]   ;;  %s38_s11 = int_to_ptr.hbm [resolvable:$true] %s37_s11 }
   0x2   :  { %s39_s13 = sshll.u32 %s822_s12, 4  ;;  %s22_s16 = sshll.u32 %s941_s1, 4  ;;  %s40_s13 = int_to_ptr.vmem [resolvable:$true] %s39_s13  ;;  %s23_s16 = int_to_ptr.hbm [resolvable:$true] %s22_s16 }
   0x3   :  { %s823_s17 = smov 64   ;;  %s824_s18 = smov 4  }
   0x4   :  { %45 = dma.hbm_to_vmem [thread:$0]  %s38_s11, 1024, %s40_s13, [#allocation5], %s823_s17, %s823_s17, %s824_s18  }
   0x5   :  { %s825_s19 = smov [#allocation2]   ;;  %s52_s23 = sshll.u32 %s945_s5, 4  ;;  %s53_s23 = int_to_ptr.hbm [resolvable:$true] %s52_s23 }
   0x6   :  { %s24_s20 = sshll.u32 %s825_s19, 4  ;;  %s826_s3 = smov [#allocation6]   ;;  %s25_s20 = int_to_ptr.vmem [resolvable:$true] %s24_s20 }
   0x7   :  { %30 = dma.hbm_to_vmem [thread:$0]  %s23_s16, 1216, %s25_s20, [#allocation3], %s823_s17, %s823_s17, %s824_s18  }
   0x8   :  { %s54_s24 = sshll.u32 %s826_s3, 4  ;;  %s55_s24 = int_to_ptr.vmem [resolvable:$true] %s54_s24 }
   0x9   :  { %60 = dma.hbm_to_vmem [thread:$0]  %s53_s23, 1024, %s55_s24, [#allocation5], %s823_s17, %s823_s17, %s824_s18  }
   0xa   :  { %818 = dma.done.wait [#allocation3], 1216  }
   0xb   :  { %819 = vsyncadd [#allocation3], 4294966080 }
   0xc   :  { %820 = dma.done.wait [#allocation5], 2048  }
   0xd   :  { %821 = vsyncadd [#allocation5], 4294965248  ;;  %v687_v0 = vld [vmem:[#allocation2 + $0x38] sm:$0xff]  ;;  %v104_v1 = vld [vmem:[#allocation2 + $0x48] sm:$0x7]  ;;  %vm170_vm0 = vcmask 1042432  }
   0xe   :  { %174 = vmatpush.bf16.msra.mxu0 %v687_v0  ;;  %v686_v2 = vld [vmem:[#allocation2 + $0x30] sm:$0xff]  ;;  %v146_v3 = vunpack.c.l.b16 %v104_v1  ;;  %v696_v5 = vld [vmem:[#allocation4 + $0x38] sm:$0xff]  ;;  %v83_v10 = vld [vmem:[%s940_s0 + $0x18] sm:$0xff]  ;;  %vm166_vm1 = vcmask 179200  }
   0xf   :  { %v685_v6 = vld [vmem:[#allocation2 + $0x28] sm:$0xff]  ;;  %273 = vmatpush.bf16.msra.mxu2 %v696_v5  ;;  %v688_v8 = vld [vmem:[#allocation2 + $0x40] sm:$0xff]  ;;  %v683_v13 = vld [vmem:[#allocation2 + $0x18] sm:$0xff] }
  0x10   :  { %v156_v4 = vpack.c.b16 %v146_v3, %v146_v3  ;;  %v81_v9 = vld [vmem:[%s940_s0 + $0x8] sm:$0xff]  ;;  %v684_v11 = vld [vmem:[#allocation2 + $0x20] sm:$0xff]  ;;  %v682_v14 = vld [vmem:[#allocation2 + $0x10] sm:$0xff] }
  0x11   :  { %v85_v12 = vpack.c.bf16 %v83_v10, %v81_v9  ;;  %v681_v15 = vld [vmem:[#allocation2 + $0x8] sm:$0xff]  ;;  %v680_v16 = vld [vmem:[#allocation2] sm:$0xff]  ;;  %v82_v18 = vld [vmem:[%s940_s0 + $0x10] sm:$0xff] }
  0x12   :  { %175 = vmatpush.bf16.msra.mxu0 %v686_v2  ;;  %v172_v7 = vsel %vm170_vm0, %v156_v4, 0  ;;  %v80_v17 = vld [vmem:[%s940_s0] sm:$0xff]  ;;  %v694_v21 = vld [vmem:[#allocation4 + $0x28] sm:$0xff]  ;;  %v693_v22 = vld [vmem:[#allocation4 + $0x20] sm:$0xff] }
  0x13   :  { %194 = vmatpush.bf16.msra.mxu1 %v172_v7  ;;  %v84_v19 = vpack.c.bf16 %v82_v18, %v80_v17  ;;  %v695_v20 = vld [vmem:[#allocation4 + $0x30] sm:$0xff]  ;;  %v692_v23 = vld [vmem:[#allocation4 + $0x18] sm:$0xff]  ;;  %v690_v25 = vld [vmem:[#allocation4 + $0x8] sm:$0xff] }
  0x14   :  { %274 = vmatpush.bf16.msra.mxu2 %v695_v20  ;;  %v691_v24 = vld [vmem:[#allocation4 + $0x10] sm:$0xff]  ;;  %v689_v26 = vld [vmem:[#allocation4] sm:$0xff]  ;;  %v704_v39 = vld [vmem:[#allocation6 + $0x38] sm:$0xff] }
  0x15   :  { %v718_v28 = vld [vmem:[%s942_s2] ss:$0 sm:$0xff]  ;;  %394 = vmatpush.bf16.msra.mxu3 %v704_v39  ;;  %v702_v41 = vld [vmem:[#allocation6 + $0x28] sm:$0xff]  ;;  %v701_v42 = vld [vmem:[#allocation6 + $0x20] sm:$0xff] }
  0x16   :  { %176 = vmatpush.bf16.msra.mxu0 %v685_v6  ;;  %v703_v40 = vld [vmem:[#allocation6 + $0x30] sm:$0xff]  ;;  %v700_v43 = vld [vmem:[#allocation6 + $0x18] sm:$0xff]  ;;  %v698_v46 = vld [vmem:[#allocation6 + $0x8] sm:$0xff] }
  0x17   :  { %195 = vmatpush.bf16.msra.mxu1 %v688_v8  ;;  %v699_v44 = vld [vmem:[#allocation6 + $0x10] sm:$0xff]  ;;  %v697_v49 = vld [vmem:[#allocation6] sm:$0xff] }
  0x18   :  { %275 = vmatpush.bf16.msra.mxu2 %v694_v21  ;;  %v719_v45 = vld [vmem:[%s944_s4] ss:$0 sm:$0xff]  ;;  %v712_v53 = vld [vmem:[%s947_s7 + $0x38] sm:$0xff]  ;;  %v711_v56 = vld [vmem:[%s947_s7 + $0x30] sm:$0xff] }
  0x19   :  { %395 = vmatpush.bf16.msra.mxu3 %v703_v40  ;;  %v710_v58 = vld [vmem:[%s947_s7 + $0x28] sm:$0xff]  ;;  %v709_v18 = vld [vmem:[%s947_s7 + $0x20] sm:$0xff]  ;;  %v707_v20 = vld [vmem:[%s947_s7 + $0x10] sm:$0xff] }
  0x1a   :  { %177 = vmatpush.bf16.msra.mxu0 %v684_v11  ;;  %581 = vmatmul.msk.bf16.vlgmr.msra.gmra.mxu1 %vm166_vm1, %v85_v12  ;;  %v706_v21 = vld [vmem:[%s947_s7 + $0x8] sm:$0xff] }
  0x1b   :  { %479 = vmatpush.bf16.msrb.mxu1 %v712_v53 }
  0x1c   :  { %276 = vmatpush.bf16.msra.mxu2 %v693_v22  ;;  %v705_v22 = vld [vmem:[%s947_s7] sm:$0xff] }
  0x1d   :  { %396 = vmatpush.bf16.msra.mxu3 %v702_v41 }
  0x1e   :  { %178 = vmatpush.bf16.msra.mxu0 %v683_v13 }
  0x1f   :  { %480 = vmatpush.bf16.msrb.mxu1 %v711_v56 }
  0x20   :  { %277 = vmatpush.bf16.msra.mxu2 %v692_v23 }
  0x21   :  { %397 = vmatpush.bf16.msra.mxu3 %v701_v42 }
  0x22   :  { %179 = vmatpush.bf16.msra.mxu0 %v682_v14 }
  0x23   :  { %481 = vmatpush.bf16.msrb.mxu1 %v710_v58 }
  0x24   :  { %278 = vmatpush.bf16.msra.mxu2 %v691_v24  ;;  %v720_v24 = vld [vmem:[%s946_s6] ss:$0 sm:$0xff] }
  0x25   :  { %398 = vmatpush.bf16.msra.mxu3 %v700_v43 }
  0x26   :  { %180 = vmatpush.bf16.msra.mxu0 %v681_v15 }
  0x27   :  { %482 = vmatpush.bf16.msrb.mxu1 %v709_v18 }
  0x28   :  { %279 = vmatpush.bf16.msra.mxu2 %v690_v25 }
  0x29   :  { %399 = vmatpush.bf16.msra.mxu3 %v699_v44 }
  0x2a   :  { %181 = vmatpush.bf16.msra.mxu0 %v680_v16 }
  0x2c   :  { %280 = vmatpush.bf16.msra.mxu2 %v689_v26 }
  0x2d   :  { %182 = vmatmul.bf16.vlgmr.msra.gmra.mxu0 %v84_v19  ;;  %400 = vmatpush.bf16.msra.mxu3 %v698_v46  ;;  %v708_v19 = vld [vmem:[%s947_s7 + $0x18] sm:$0xff] }
  0x2e   :  { %483 = vmatpush.bf16.msrb.mxu1 %v708_v19 }
  0x31   :  { %401 = vmatpush.bf16.msra.mxu3 %v697_v49 }
  0x32   :  { %484 = vmatpush.bf16.msrb.mxu1 %v707_v20 }
  0x36   :  { %485 = vmatpush.bf16.msrb.mxu1 %v706_v21 }
  0x3a   :  { %486 = vmatpush.bf16.msrb.mxu1 %v705_v22 }
  0x97   :  { %v197_v27 = vpop.f32.mrf.mxu1 }
  0x9f   :  { %v199_v34 = vpop.f32.mrf.mxu1 }
  0xaa   :  { %v183_v29 = vpop.f32.mrf.mxu0 }
  0xab   :  { %v184_v30 = vadd.f32 %v718_v28, %v183_v29 }
  0xad   :  { %v198_v31 = vadd.f32 %v197_v27, %v184_v30 }
  0xaf   :  { %722 = vtanh.f32 %v198_v31  ;;  %v721_v31 = vld [vmem:[%s948_s8] ss:$0 sm:$0xff] }
  0xb2   :  { %v185_v32 = vpop.f32.mrf.mxu0 }
  0xb3   :  { %v186_v33 = vadd.f32 %v718_v28, %v185_v32 }
  0xb5   :  { %v200_v35 = vadd.f32 %v199_v34, %v186_v33  ;;  %v723_v36 = vpop.eup %722 }
  0xb7   :  { %724 = vtanh.f32 %v200_v35 }
  0xbd   :  { %v725_v37 = vpop.eup %724 }
  0xbe   :  { %v204_v38 = vpack.c.bf16 %v725_v37, %v723_v36 }
  0xc0   :  { %281 = vmatmul.bf16.vlgmr.msra.gmra.mxu2 %v204_v38 }
 0x143   :  { %v282_v47 = vpop.f32.mrf.mxu2 }
 0x144   :  { %v283_v48 = vadd.f32 %v719_v45, %v282_v47 }
 0x146   :  { %v614_v50 = vmul.f32 -1.442695, %v283_v48 }
 0x148   :  { %726 = vpow2.f32 %v614_v50 }
 0x14b   :  { %v284_v51 = vpop.f32.mrf.mxu2 }
 0x14c   :  { %v285_v52 = vadd.f32 %v719_v45, %v284_v51 }
 0x14e   :  { %v727_v54 = vpop.eup %726  ;;  %v615_v55 = vmul.f32 -1.442695, %v285_v52 }
 0x14f   :  { %v293_v57 = vadd.f32 1.0, %v727_v54 }
 0x150   :  { %728 = vpow2.f32 %v615_v55 }
 0x151   :  { %730 = vrcp.f32 %v293_v57  ;;  %vm300_vm3 = vweird.f32 %v293_v57  ;;  %v306_v5 = vand.u32 2147483648, %v293_v57  ;;  %v304_v7 = vand.u32 2147483647, %v293_v57 }
 0x153   :  { %v307_v12 = vor.u32 1.1754944e-38, %v306_v5  ;;  %vm305_vm8 = vcmp.eq.f32.partialorder %v304_v7, 8.507059e+37 }
 0x156   :  { %v729_v59 = vpop.eup %728 }
 0x157   :  { %v731_v60 = vpop.eup %730  ;;  %v294_v61 = vadd.f32 1.0, %v729_v59 }
 0x158   :  { %v296_v62 = vmul.f32 %v731_v60, %v293_v57  ;;  %vm301_vm2 = vweird.f32 %v731_v60 }
 0x159   :  { %732 = vrcp.f32 %v294_v61  ;;  %v321_v6 = vand.u32 2147483648, %v294_v61  ;;  %v319_v9 = vand.u32 2147483647, %v294_v61  ;;  %vm302_vm5 = vmor %vm300_vm3, %vm301_vm2  ;;  %vm315_vm6 = vweird.f32 %v294_v61 }
 0x15a   :  { %v297_v63 = vsub.f32 1.0, %v296_v62 }
 0x15b   :  { %v322_v13 = vor.u32 1.1754944e-38, %v321_v6  ;;  %vm320_vm9 = vcmp.eq.f32.partialorder %v319_v9, 8.507059e+37 }
 0x15c   :  { %v298_v0 = vmul.f32 %v731_v60, %v297_v63 }
 0x15e   :  { %v299_v3 = vadd.f32 %v731_v60, %v298_v0 }
 0x15f   :  { %v733_v1 = vpop.eup %732 }
 0x160   :  { %v311_v2 = vmul.f32 %v733_v1, %v294_v61  ;;  %vm316_vm4 = vweird.f32 %v733_v1  ;;  %v303_v10 = vsel %vm302_vm5, %v731_v60, %v299_v3 }
 0x161   :  { %vm317_vm7 = vmor %vm315_vm6, %vm316_vm4  ;;  %v308_v15 = vsel %vm305_vm8, %v307_v12, %v303_v10 }
 0x162   :  { %v312_v4 = vsub.f32 1.0, %v311_v2 }
 0x164   :  { %v313_v8 = vmul.f32 %v733_v1, %v312_v4 }
 0x166   :  { %v314_v11 = vadd.f32 %v733_v1, %v313_v8 }
 0x168   :  { %v318_v14 = vsel %vm317_vm7, %v733_v1, %v314_v11 }
 0x169   :  { %v323_v16 = vsel %vm320_vm9, %v322_v13, %v318_v14 }
 0x16a   :  { %v325_v17 = vpack.c.bf16 %v323_v16, %v308_v15 }
 0x16c   :  { %402 = vmatmul.bf16.vlgmr.msra.gmra.mxu3 %v325_v17 }
 0x1ef   :  { %v403_v23 = vpop.f32.mrf.mxu3 }
 0x1f0   :  { %v404_v25 = vadd.f32 %v720_v24, %v403_v23 }
 0x1f2   :  { %734 = vtanh.f32 %v404_v25 }
 0x1f7   :  { %v405_v26 = vpop.f32.mrf.mxu3 }
 0x1f8   :  { %v406_v27 = vadd.f32 %v720_v24, %v405_v26  ;;  %v735_v28 = vpop.eup %734 }
 0x1fa   :  { %736 = vtanh.f32 %v406_v27 }
 0x200   :  { %v737_v29 = vpop.eup %736 }
 0x201   :  { %v410_v30 = vpack.c.bf16 %v737_v29, %v735_v28 }
 0x203   :  { %487 = vmatmul.bf16.vlgmr.msrb.gmra.mxu1 %v410_v30 }
 0x280   :  { %v488_v32 = vpop.f32.mrf.mxu1 }
 0x281   :  { %v489_v33 = vadd.f32 %v721_v31, %v488_v32 }
 0x283   :  { %493 = vmax.xlane.f32.xlu0 %v489_v33 }
 0x288   :  { %v490_v34 = vpop.f32.mrf.mxu1 }
 0x289   :  { %v491_v35 = vadd.f32 %v721_v31, %v490_v34 }
 0x28b   :  { %495 = vmax.xlane.f32.xlu0 %v491_v35 }
 0x2f6   :  { %v494_v36 = vpop.xlane.xlu0 %493 }
 0x2f7   :  { %v497_v37 = vsub.f32 %v489_v33, %v494_v36 }
 0x2f9   :  { %v499_v38 = vmul.f32 1.442695, %v497_v37 }
 0x2fb   :  { %738 = vpow2.f32 %v499_v38 }
 0x2fe   :  { %v496_v39 = vpop.xlane.xlu0 %495 }
 0x2ff   :  { %v498_v40 = vsub.f32 %v491_v35, %v496_v39 }
 0x301   :  { %v739_v41 = vpop.eup %738  ;;  %v501_v42 = vmul.f32 1.442695, %v498_v40 }
 0x302   :  { %503 = vadd.xlane.f32.xlu1 %v739_v41 }
 0x303   :  { %740 = vpow2.f32 %v501_v42 }
 0x309   :  { %v741_v43 = vpop.eup %740 }
 0x30a   :  { %505 = vadd.xlane.f32.xlu1 %v741_v43 }
 0x375   :  { %v504_v44 = vpop.xlane.xlu1 %503 }
 0x376   :  { %742 = vrcp.f32 %v504_v44  ;;  %v518_v49 = vand.u32 2147483648, %v504_v44  ;;  %v516_v51 = vand.u32 2147483647, %v504_v44  ;;  %vm512_vm11 = vweird.f32 %v504_v44 }
 0x378   :  { %v519_v54 = vor.u32 1.1754944e-38, %v518_v49  ;;  %vm517_vm13 = vcmp.eq.f32.partialorder %v516_v51, 8.507059e+37 }
 0x37c   :  { %v743_v45 = vpop.eup %742 }
 0x37d   :  { %v508_v46 = vmul.f32 %v743_v45, %v504_v44  ;;  %v506_v47 = vpop.xlane.xlu1 %505  ;;  %vm513_vm10 = vweird.f32 %v743_v45 }
 0x37e   :  { %744 = vrcp.f32 %v506_v47  ;;  %vm514_vm12 = vmor %vm512_vm11, %vm513_vm10  ;;  %v533_v60 = vand.u32 2147483648, %v506_v47  ;;  %v531_v62 = vand.u32 2147483647, %v506_v47  ;;  %vm527_vm15 = vweird.f32 %v506_v47 }
 0x37f   :  { %v509_v48 = vsub.f32 1.0, %v508_v46 }
 0x380   :  { %v534_v0 = vor.u32 1.1754944e-38, %v533_v60  ;;  %vm532_vm1 = vcmp.eq.f32.partialorder %v531_v62, 8.507059e+37 }
 0x381   :  { %v510_v50 = vmul.f32 %v743_v45, %v509_v48 }
 0x383   :  { %v511_v52 = vadd.f32 %v743_v45, %v510_v50 }
 0x384   :  { %v745_v53 = vpop.eup %744 }
 0x385   :  { %v515_v55 = vsel %vm514_vm12, %v743_v45, %v511_v52  ;;  %v523_v56 = vmul.f32 %v745_v53, %v506_v47  ;;  %vm528_vm14 = vweird.f32 %v745_v53 }
 0x386   :  { %v520_v57 = vsel %vm517_vm13, %v519_v54, %v515_v55  ;;  %vm529_vm0 = vmor %vm527_vm15, %vm528_vm14 }
 0x387   :  { %v521_v58 = vmul.f32 %v739_v41, %v520_v57  ;;  %v524_v59 = vsub.f32 1.0, %v523_v56 }
 0x389   :  { %537 = vst [vmem:[%s949_s9] sm:$0xff] %v521_v58  ;;  %v525_v61 = vmul.f32 %v745_v53, %v524_v59 }
 0x38b   :  { %v526_v63 = vadd.f32 %v745_v53, %v525_v61 }
 0x38d   :  { %v530_v1 = vsel %vm529_vm0, %v745_v53, %v526_v63 }
 0x38e   :  { %v535_v2 = vsel %vm532_vm1, %v534_v0, %v530_v1 }
 0x38f   :  { %v536_v3 = vmul.f32 %v741_v43, %v535_v2 }
 0x391   :  { %538 = vst [vmem:[%s949_s9 + $0x8] sm:$0xff] %v536_v3 }
 0x392   :  { %543 = vsyncpa [#allocation3], 1 }
 0x393   :  { %544 = vsyncpa [#allocation5], 1 }

</bundles_post_ra>
